<compile_context>
chip_gen: v7x
topology: tpu7x:2x2x1
jax: 0.10.0
libtpu: 0.0.40
codegen_flags: <defaults>
</compile_context>

<pallas_src>
import functools

import jax
import jax.numpy as jnp
from jax.experimental import pallas as pl
from jax.experimental.pallas import tpu as pltpu


def _round_up(x, m):
    return ((x + m - 1) // m) * m


def _pad2d(x, rows, cols):
    pr, pc = rows - x.shape[0], cols - x.shape[1]
    if pr == 0 and pc == 0:
        return x
    return jnp.pad(x, ((0, pr), (0, pc)))


def _prep_kernel(*refs, norm, feat_first):
    """Row tile: nrm = rsqrt(max(deg, 1)); h = (feat * nrm) [@ W]."""
    it = iter(refs)
    adj_ref = next(it) if norm else None
    feat_ref = next(it)
    w_ref = next(it) if feat_first else None
    h_ref = next(it)
    nrm_ref = next(it) if norm else None

    feat = feat_ref[...].astype(jnp.float32)
    if norm:
        deg = jnp.sum(adj_ref[...].astype(jnp.float32), axis=1, keepdims=True)
        # Clamp degree (DGL semantics / avoids inf for isolated or padded rows).
        nrm = jax.lax.rsqrt(jnp.maximum(deg, 1.0))
        nrm_ref[...] = nrm
        feat = feat * nrm
    if feat_first:
        feat = jnp.dot(feat, w_ref[...].astype(jnp.float32),
                       preferred_element_type=jnp.float32)
    h_ref[...] = feat.astype(h_ref.dtype)


def _agg_kernel(*refs, norm, feat_first, use_bias):
    """Row tile: rst = adj_tile @ h [@ W]; rst *= nrm_tile; rst += bias."""
    it = iter(refs)
    adj_ref = next(it)
    h_ref = next(it)
    w_ref = None if feat_first else next(it)
    nrm_ref = next(it) if norm else None
    b_ref = next(it) if use_bias else None
    out_ref = next(it)

    h = h_ref[...]
    adj = adj_ref[...]
    if adj.dtype != h.dtype:
        adj = adj.astype(h.dtype)
    rst = jnp.dot(adj, h, preferred_element_type=jnp.float32)
    if not feat_first:
        rst = jnp.dot(rst, w_ref[...].astype(jnp.float32),
                      preferred_element_type=jnp.float32)
    if norm:
        rst = rst * nrm_ref[...]
    if use_bias:
        rst = rst + b_ref[...].astype(jnp.float32)
    out_ref[...] = rst.astype(out_ref.dtype)


def dense_graph_conv(adj, feat, weight, bias=None, *, norm=True,
                     activation=None, block_rows=256):
    """JAX/Pallas equivalent of dgl.nn.pytorch.conv.DenseGraphConv.forward."""
    n, d_in = feat.shape
    d_out = weight.shape[1]
    assert adj.shape == (n, n)
    assert weight.shape == (d_in, d_out)

    use_bias = bias is not None
    feat_first = d_in > d_out
    out_dtype = feat.dtype

    # adj.float() in the reference: only force a float dtype (keep bf16 etc. as-is).
    if not jnp.issubdtype(adj.dtype, jnp.floating):
        adj = adj.astype(feat.dtype if jnp.issubdtype(feat.dtype, jnp.floating)
                         else jnp.float32)

    # ---- TPU-friendly padding ----
    tm = min(block_rows, _round_up(n, 8))        # row-tile size, multiple of 8
    n_p = _round_up(n, tm)                       # grid divides evenly
    d_in_p = _round_up(d_in, 128)                # lane-dense / full MXU K
    d_out_p = _round_up(d_out, 128)              # lane-dense output stores
    grid = n_p // tm

    adj_p = _pad2d(adj, n_p, n_p)
    feat_p = _pad2d(feat, n_p, d_in_p)
    w_p = _pad2d(weight, d_in_p, d_out_p)
    b_p = (_pad2d(jnp.reshape(bias, (1, d_out)), 1, d_out_p)
           if use_bias else None)

    h_dim = d_out_p if feat_first else d_in_p

    cparams = pltpu.CompilerParams(
        dimension_semantics=("parallel",),
        vmem_limit_bytes=64 * 1024 * 1024,
    )

    # ---- Pass 1: normalization vector + (optionally) hoisted feat @ W ----
    if norm or feat_first:
        prep_in, prep_specs = [], []
        if norm:
            prep_in.append(adj_p)
            prep_specs.append(pl.BlockSpec((tm, n_p), lambda i: (i, 0)))
        prep_in.append(feat_p)
        prep_specs.append(pl.BlockSpec((tm, d_in_p), lambda i: (i, 0)))
        if feat_first:
            prep_in.append(w_p)
            prep_specs.append(pl.BlockSpec((d_in_p, d_out_p), lambda i: (0, 0)))

        prep_out_shapes = [jax.ShapeDtypeStruct((n_p, h_dim), feat.dtype)]
        prep_out_specs = [pl.BlockSpec((tm, h_dim), lambda i: (i, 0))]
        if norm:
            prep_out_shapes.append(jax.ShapeDtypeStruct((n_p, 1), jnp.float32))
            prep_out_specs.append(pl.BlockSpec((tm, 1), lambda i: (i, 0)))

        prep_res = pl.pallas_call(
            functools.partial(_prep_kernel, norm=norm, feat_first=feat_first),
            out_shape=prep_out_shapes,
            grid_spec=pltpu.PrefetchScalarGridSpec(
                num_scalar_prefetch=0,
                grid=(grid,),
                in_specs=prep_specs,
                out_specs=prep_out_specs,
            ),
            compiler_params=cparams,
        )(*prep_in)
        if norm:
            h_p, nrm_p = prep_res
        else:
            (h_p,) = prep_res
            nrm_p = None
    else:
        h_p, nrm_p = feat_p, None

    # ---- Pass 2: row-tiled aggregation (+ projection, norm, bias) ----
    agg_in = [adj_p, h_p]
    agg_specs = [pl.BlockSpec((tm, n_p), lambda i: (i, 0)),
                 pl.BlockSpec((n_p, h_dim), lambda i: (0, 0))]
    if not feat_first:
        agg_in.append(w_p)
        agg_specs.append(pl.BlockSpec((d_in_p, d_out_p), lambda i: (0, 0)))
    if norm:
        agg_in.append(nrm_p)
        agg_specs.append(pl.BlockSpec((tm, 1), lambda i: (i, 0)))
    if use_bias:
        agg_in.append(b_p)
        agg_specs.append(pl.BlockSpec((1, d_out_p), lambda i: (0, 0)))

    out_p = pl.pallas_call(
        functools.partial(_agg_kernel, norm=norm, feat_first=feat_first,
                          use_bias=use_bias),
        out_shape=jax.ShapeDtypeStruct((n_p, d_out_p), out_dtype),
        grid_spec=pltpu.PrefetchScalarGridSpec(
            num_scalar_prefetch=0,
            grid=(grid,),
            in_specs=agg_specs,
            out_specs=pl.BlockSpec((tm, d_out_p), lambda i: (i, 0)),
        ),
        compiler_params=cparams,
    )(*agg_in)

    out = out_p[:n, :d_out]
    if activation is not None:       # arbitrary callable, applied outside the kernel
        out = activation(out)
    return out


def _xavier_uniform(key, shape, dtype=jnp.float32):
    fan_in, fan_out = shape
    limit = (6.0 / (fan_in + fan_out)) ** 0.5
    return jax.random.uniform(key, shape, dtype, minval=-limit, maxval=limit)


if __name__ == "__main__":
    key = jax.random.PRNGKey(0)
    k_adj, k_feat, k_w, k_b, k2_adj, k2_feat, k2_w = jax.random.split(key, 7)

    # --- Case 1: aggregate-then-project (d_in <= d_out), norm + bias,
    #             row-tiled grid of 2, padded feature dims. ---
    N, D_IN, D_OUT, TM = 256, 32, 64, 128
    adj = (jax.random.uniform(k_adj, (N, N)) > 0.7).astype(jnp.float32)
    adj = adj + jnp.eye(N, dtype=jnp.float32)                 # self loops
    feat = jax.random.normal(k_feat, (N, D_IN), jnp.float32)
    weight = _xavier_uniform(k_w, (D_IN, D_OUT))
    bias = 0.1 * jax.random.normal(k_b, (D_OUT,), jnp.float32)

    out = dense_graph_conv(adj, feat, weight, bias, norm=True, block_rows=TM)
    out = jax.block_until_ready(out)

    deg = adj.sum(axis=1, keepdims=True)
    nrm = jnp.maximum(deg, 1.0) ** -0.5
    ref = ((adj @ (feat * nrm)) @ weight) * nrm + bias
    assert out.shape == (N, D_OUT)
    assert jnp.allclose(out, ref, atol=1e-3, rtol=1e-3), \
        float(jnp.max(jnp.abs(out - ref)))

    # --- Case 2: project-then-aggregate (d_in > d_out), no bias, activation. ---
    N2, D_IN2, D_OUT2 = 128, 128, 64
    adj2 = (jax.random.uniform(k2_adj, (N2, N2)) > 0.5).astype(jnp.float32)
    adj2 = adj2 + jnp.eye(N2, dtype=jnp.float32)
    feat2 = jax.random.normal(k2_feat, (N2, D_IN2), jnp.float32)
    w2 = _xavier_uniform(k2_w, (D_IN2, D_OUT2))

    out2 = dense_graph_conv(adj2, feat2, w2, None, norm=True,
                            activation=jnp.tanh, block_rows=128)
    out2 = jax.block_until_ready(out2)

    deg2 = adj2.sum(axis=1, keepdims=True)
    nrm2 = jnp.maximum(deg2, 1.0) ** -0.5
    ref2 = jnp.tanh((adj2 @ ((feat2 * nrm2) @ w2)) * nrm2)
    assert out2.shape == (N2, D_OUT2)
    assert jnp.allclose(out2, ref2, atol=1e-3, rtol=1e-3), \
        float(jnp.max(jnp.abs(out2 - ref2)))

    print("KERNEL_OK")
</pallas_src>

<mosaic_0001>
module attributes {stable_mosaic.version = 11 : i64} {
  func.func @_prep_kernel(%arg0: i32, %arg1: memref<128x256xf32, #tpu.memory_space<vmem>>, %arg2: memref<128x128xf32, #tpu.memory_space<vmem>>, %arg3: memref<128x128xf32, #tpu.memory_space<vmem>>, %arg4: memref<128x1xf32, #tpu.memory_space<vmem>>) attributes {dimension_semantics = [#tpu.dimension_semantics<parallel>], iteration_bounds = array<i64: 2>, scalar_prefetch = 0 : i64, scratch_operands = 0 : i64, tpu.core_type = #tpu.core_type<tc>, window_params = [{transform_indices = @transform_0, window_bounds = array<i64: 128, 256>}, {transform_indices = @transform_1, window_bounds = array<i64: 128, 128>}, {transform_indices = @transform_2, window_bounds = array<i64: 128, 128>}, {transform_indices = @transform_3, window_bounds = array<i64: 128, 1>}]} {
    %c0 = arith.constant 0 : index
    %c0_0 = arith.constant 0 : index
    %0 = vector.load %arg2[%c0, %c0_0] : memref<128x128xf32, #tpu.memory_space<vmem>>, vector<128x128xf32>
    %c0_1 = arith.constant 0 : index
    %c0_2 = arith.constant 0 : index
    %1 = vector.load %arg1[%c0_1, %c0_2] : memref<128x256xf32, #tpu.memory_space<vmem>>, vector<128x256xf32>
    %cst = arith.constant dense<0.000000e+00> : vector<128xf32>
    %2 = vector.multi_reduction <add>, %1, %cst [1] : vector<128x256xf32> to vector<128xf32>
    %3 = vector.shape_cast %2 : vector<128xf32> to vector<128x1xf32>
    %cst_3 = arith.constant 1.000000e+00 : f32
    %4 = vector.broadcast %cst_3 : f32 to vector<128x1xf32>
    %5 = arith.maximumf %3, %4 : vector<128x1xf32>
    %6 = math.rsqrt %5 : vector<128x1xf32>
    %c0_4 = arith.constant 0 : index
    %c0_5 = arith.constant 0 : index
    %7 = vector.load %arg4[%c0_4, %c0_5] : memref<128x1xf32, #tpu.memory_space<vmem>>, vector<128x1xf32>
    tpu.vector_store %arg4[%c0_4, %c0_5], %6 {strides = array<i32>} : memref<128x1xf32, #tpu.memory_space<vmem>>, vector<128x1xf32>,
    %8 = vector.broadcast %6 : vector<128x1xf32> to vector<128x128xf32>
    %9 = arith.mulf %0, %8 : vector<128x128xf32>
    %c0_6 = arith.constant 0 : index
    %c0_7 = arith.constant 0 : index
    %10 = vector.load %arg3[%c0_6, %c0_7] : memref<128x128xf32, #tpu.memory_space<vmem>>, vector<128x128xf32>
    tpu.vector_store %arg3[%c0_6, %c0_7], %9 {strides = array<i32>} : memref<128x128xf32, #tpu.memory_space<vmem>>, vector<128x128xf32>,
    return
  }
  func.func @transform_0(%arg0: i32) -> (i32, i32) {
    %c0_i32 = arith.constant 0 : i32
    %c0_i32_0 = arith.constant 0 : i32
    return %arg0, %c0_i32 : i32, i32
  }
  func.func @transform_1(%arg0: i32) -> (i32, i32) {
    %c0_i32 = arith.constant 0 : i32
    %c0_i32_0 = arith.constant 0 : i32
    return %arg0, %c0_i32 : i32, i32
  }
  func.func @transform_2(%arg0: i32) -> (i32, i32) {
    %c0_i32 = arith.constant 0 : i32
    %c0_i32_0 = arith.constant 0 : i32
    return %arg0, %c0_i32 : i32, i32
  }
  func.func @transform_3(%arg0: i32) -> (i32, i32) {
    %c0_i32 = arith.constant 0 : i32
    %c0_i32_0 = arith.constant 0 : i32
    return %arg0, %c0_i32 : i32, i32
  }
}

</mosaic_0001>

<bundles_post_ra>
// kernel: tpu_custom_call.1
= control target key start
LH: loop header
LB: loop body
LE: loop exit
PB: predicated region body
PF: predicated region fallthrough
CT: control target
= control target key end

     0   :  { %9 = vsyncpa [#allocation3], 0  ;;  %s1261_s0 = inlined_call_operand.hbm [shape: f32[256,256], index: 0, kind: input, shape index: {}]   ;;  %s1262_s1 = inlined_call_operand.hbm [shape: f32[256,128], index: 1, kind: input, shape index: {}]   ;;  %s1263_s2 = inlined_call_operand.hbm [shape: f32[256,128], index: 2, kind: output, shape index: {0}]   ;;  %s1264_s3 = inlined_call_operand.hbm [shape: f32[256,1], index: 3, kind: output, shape index: {1}]  }
   0x1   :  { %11 = vsyncpa [#allocation3 + $0x1], 0 }
   0x2   :  { %12 = vsyncpa [#allocation6], 0 }
   0x3   :  { %14 = vsyncpa [#allocation6 + $0x1], 0 }
   0x4   :  { %15 = vsyncpa [#allocation4], 0 }
   0x5   :  { %17 = vsyncpa [#allocation4 + $0x1], 0 }
   0x6   :  { %18 = vsyncpa [#allocation9], 0 }
   0x7   :  { %20 = vsyncpa [#allocation9 + $0x1], 0  ;;  %s901_s12 = smov 0   ;;  %s903_s13 = smov 0  }
   0x8   :  { %s905_s14 = smov 0   ;;  %s907_s15 = smov 0  }
   0x9 LB: > { %s922_s16 = sadd.s32 4294967295, %s869_s15   ;;  %s585_s17 = sadd.s32 4294967294, %s869_s15   ;;  %s869_s15 = sphi %s907_s15, %s1280_s15   ;;  %s865_s14 = sphi %s905_s14, %s1279_s14   ;;  %s861_s13 = sphi %s903_s13, %s1278_s13   ;;  %s857_s12 = sphi %s901_s12, %s1277_s12  }
   0xa   : > { %s926_s18 = sadd.s32 1, %s869_s15   ;;  %s33_s19 = sadd.s32 1, %s865_s14 }
   0xb   : > { %s30_s20 = ssub.s32 %s869_s15, %s926_s18  ;;  %p40_p0 = scmp.ne.s32.totalorder %s865_s14, %s861_s13 }
   0xc   : > { %p31_p1 = scmp.eq.s32.totalorder %s30_s20, 0  ;;  %p41_p2 = scmp.eq.s32.totalorder %s869_s15, 0 }
   0xd   : > { %p46_p3 = scmp.ne.s32.totalorder %s861_s13, %s857_s12  ;;  %p47_p4 = scmp.eq.s32.totalorder %s922_s16, 0 }
   0xe   : > { %s938_s21 = scalar_select %p31_p1, %s865_s14, %s33_s19  }
   0xf   : > { %p940_p5 = por %p41_p2, %p40_p0  ;;  %p944_p6 = por %p47_p4, %p46_p3 }
  0x10   : > { %p96_p7 = scmp.eq.s32.totalorder %s922_s16, 1  ;;  %p102_p8 = scmp.eq.s32.totalorder %s585_s17, 1 }
  0x11   : > { %s1268_s23 = scalar_select %p944_p6, 1, 0 }
  0x12   : > { %p635_p10 = scmp.lt.s32.totalorder %s869_s15, 2  ;;  %p951_p11 = por %p96_p7, %p40_p0 }
  0x13   : > { %p955_p12 = por %p102_p8, %p46_p3  ;;  %s960_s26 = sand.u32 1, %s865_s14  }
  0x14   : > { %s1269_s24 = scalar_select %p951_p11, 1, 0 }
  0x15   : > { %s1270_s25 = scalar_select %p955_p12, 1, 0 }
  0x16   : > { %s609_s27 = sshll.u32 %s869_s15, 12  ;;  %s588_s28 = sshll.u32 %s960_s26, 8 }
  0x17   : > { %s967_s4 = scalar_lea.hbm %s1261_s0, %s609_s27  ;;  %s152_s5 = scalar_lea.vmem [#allocation2], %s588_s28 }
  0x18   : > { %s160_s6 = sshll.u32 %s152_s5, 4  ;;  %p971_p13 = pnand %p635_p10, %p940_p5  ;;  %s975_s6 = int_to_ptr.vmem [resolvable:$true] %s160_s6 }
  0x19   : > { %s149_s8 = scalar_lea.sflag [#allocation3], %s960_s26  ;;  %s707_s9 = scalar_lea.hbm %s967_s4, 4096 }
  0x1a   : > { %p708_p0 = scmp.ne.s32.totalorder %s967_s4, %s707_s9  ;;  %p709_p1 = pneg %p971_p13 }
  0x1b   : > { %s712_s17 = scalar_lea.hbm %s1261_s0, 8192  ;;  %p713_p4 = scmp.lt.u32.totalorder %s967_s4, %s1261_s0 }
  0x1c   : > { %p710_p2 = pnand %p709_p1, %p708_p0  ;;  %p714_p5 = scmp.lt.u32.totalorder %s712_s17, %s707_s9 }
  0x1d   : > { %p716_p8 = scmp.lt.u32.totalorder %s707_s9, %s967_s4 }
  0x1e   : > { %p711_p3 = pneg %p710_p2  ;;  %p715_p7 = por %p714_p5, %p713_p4 }
  0x20   : > { %p717_p10 = por %p716_p8, %p715_p7 }
  0x22   : > { %p718_p9 = pnand %p717_p10, %p711_p3 }
  0x24   : > { %721 = shalt.err (!%p718_p9)
}
  0x25   : > { %s722_s22 = scalar_lea.vmem %s975_s6, 4096  ;;  %s871_s27 = smov [#allocation2]  }
  0x26   : > { %p723_p0 = scmp.ne.s32.totalorder %s975_s6, %s722_s22  ;;  %s727_s28 = sshll.u32 %s871_s27, 4  ;;  %s728_s28 = int_to_ptr.vmem [resolvable:$false] %s727_s28 }
  0x27   : > { %s729_s29 = scalar_lea.vmem %s728_s28, 8192  ;;  %p730_p11 = scmp.lt.s32.totalorder %s975_s6, %s728_s28 }
  0x28   : > { %p725_p2 = pnand %p723_p0, %p709_p1  ;;  %p731_p4 = scmp.lt.s32.totalorder %s729_s29, %s722_s22 }
  0x2a   : > { %p726_p12 = pneg %p725_p2  ;;  %p732_p5 = por %p731_p4, %p730_p11 }
  0x2c   : > { %p733_p7 = pnand %p732_p5, %p726_p12 }
  0x2e   : > { %736 = shalt.err (!%p733_p7)
}
  0x2f   : > { %s872_s30 = smov 256   ;;  %s873_s5 = smov 16  }
  0x30   : > { %624 = dma.hbm_to_vmem [thread:$0]  (!%p971_p13), %s967_s4, 4096, %s975_s6, %s149_s8, %s872_s30, %s872_s30, %s873_s5  }
  0x31   : > { %p595_p9 = scmp.ge.s32.totalorder %s869_s15, 1  ;;  %p189_p3 = scmp.lt.s32.totalorder %s869_s15, 3 }
  0x32   : > { %s592_s9 = sshll.u32 %s960_s26, 7  ;;  %s610_s11 = sshll.u32 %s869_s15, 11 }
  0x33   : > { %p1008_p11 = pnand %p595_p9, %p189_p3  ;;  %s174_s17 = scalar_lea.vmem [#allocation5], %s592_s9 }
  0x34   : > { %s181_s19 = sshll.u32 %s174_s17, 4  ;;  %s1016_s27 = scalar_lea.hbm %s1262_s1, %s610_s11  ;;  %s1018_s19 = int_to_ptr.vmem [resolvable:$true] %s181_s19 }
  0x35   : > { %s171_s4 = scalar_lea.sflag [#allocation6], %s960_s26  ;;  %s737_s6 = scalar_lea.hbm %s1016_s27, 2048 }
  0x36   : > { %p738_p12 = scmp.ne.s32.totalorder %s1016_s27, %s737_s6  ;;  %s742_s29 = scalar_lea.hbm %s1262_s1, 4096 }
  0x37   : > { %p743_p0 = scmp.lt.u32.totalorder %s1016_s27, %s1262_s1  ;;  %p744_p2 = scmp.lt.u32.totalorder %s742_s29, %s737_s6 }
  0x38   : > { %p740_p8 = pnand %p738_p12, %p709_p1  ;;  %p746_p5 = scmp.lt.u32.totalorder %s737_s6, %s1016_s27 }
  0x39   : > { %p745_p4 = por %p744_p2, %p743_p0 }
  0x3a   : > { %p741_p10 = pneg %p740_p8 }
  0x3b   : > { %p747_p7 = por %p746_p5, %p745_p4 }
  0x3d   : > { %p748_p9 = pnand %p747_p7, %p741_p10 }
  0x3f   : > { %751 = shalt.err (!%p748_p9)
}
  0x40   : > { %s752_s9 = scalar_lea.vmem %s1018_s19, 2048  ;;  %s874_s11 = smov [#allocation5]  }
  0x41   : > { %p753_p3 = scmp.ne.s32.totalorder %s1018_s19, %s752_s9  ;;  %s757_s17 = sshll.u32 %s874_s11, 4  ;;  %s758_s17 = int_to_ptr.vmem [resolvable:$false] %s757_s17 }
  0x42   : > { %s759_s20 = scalar_lea.vmem %s758_s17, 4096  ;;  %p760_p6 = scmp.lt.s32.totalorder %s1018_s19, %s758_s17 }
  0x43   : > { %p755_p12 = pnand %p753_p3, %p709_p1  ;;  %p761_p0 = scmp.lt.s32.totalorder %s759_s20, %s752_s9 }
  0x45   : > { %p756_p8 = pneg %p755_p12  ;;  %p762_p2 = por %p761_p0, %p760_p6 }
  0x47   : > { %p763_p4 = pnand %p762_p2, %p756_p8 }
  0x49   : > { %766 = shalt.err (!%p763_p4)
}
  0x4a   : > { %s875_s22 = smov 128   ;;  %s876_s6 = smov 8  }
  0x4b   : > { %627 = dma.hbm_to_vmem [thread:$0]  (!%p971_p13), %s1016_s27, 2048, %s1018_s19, %s171_s4, %s875_s22, %s875_s22, %s876_s6  }
  0x4c   : > { %193 = sbr.rel (%p1008_p11) target bundleno = 313 (0x139), region = 28  ;;  %s1049_s8 = sand.u32 (!%p1008_p11), 1, %s861_s13  }
  0x4d   : > { %s596_s28 = sshll.u32 (!%p1008_p11), %s1049_s8, 8  ;;  %s196_s29 = scalar_lea.sflag (!%p1008_p11), [#allocation3], %s1049_s8 }
  0x4e   : > { %s1053_s30 = scalar_lea.vmem (!%p1008_p11), [#allocation2], %s596_s28  ;;  %p1273_p6 = scmp.ne.s32.totalorder (!%p1008_p11), %s1268_s23, 0 }
  0x53   : > { %840 = dma.done.wait (%p1273_p6), %s196_s29, 4096  }
  0x54   : > { %842 = vsyncadd (%p1273_p6), %s196_s29, 4294963200  ;;  %s1060_s26 = sshll.u32 %s1049_s8, 7  ;;  %s205_s7 = scalar_lea.sflag [#allocation6], %s1049_s8 }
  0x55   : > { %s1064_s10 = scalar_lea.vmem [#allocation5], %s1060_s26 }
  0x56   : > { %844 = dma.done.wait (%p1273_p6), %s205_s7, 2048  }
  0x57   : > { %846 = vsyncadd (%p1273_p6), %s205_s7, 4294965248  ;;  %v265_v0 = vld [vmem:[%s1053_s30 + $0x20] sm:$0xff]  ;;  %v266_v1 = vld [vmem:[%s1053_s30 + $0x28] sm:$0xff]  ;;  %vm373_vm0 = vcmask 7168   ;;  %s1105_s23 = scalar_lea.vmem [#allocation8], %s1060_s26  ;;  %s1113_s19 = scalar_lea.vmem [#allocation7], %s1060_s26 }
  0x58   : > { %v261_v2 = vld [vmem:[%s1053_s30] sm:$0xff]  ;;  %v299_v3 = vadd.f32 %v266_v1, %v265_v0  ;;  %v262_v4 = vld [vmem:[%s1053_s30 + $0x8] sm:$0xff]  ;;  %v267_v5 = vld [vmem:[%s1053_s30 + $0x30] sm:$0xff]  ;;  %s611_s27 = sshll.u32 %s922_s16, 11  ;;  %s457_s4 = sshll.u32 %s1105_s23, 4  ;;  %s1174_s4 = int_to_ptr.vmem [resolvable:$true] %s457_s4 }
  0x59   : > { %v268_v6 = vld [vmem:[%s1053_s30 + $0x38] sm:$0xff]  ;;  %v293_v7 = vadd.f32 %v262_v4, %v261_v2  ;;  %v263_v8 = vld [vmem:[%s1053_s30 + $0x10] sm:$0xff]  ;;  %v269_v14 = vld [vmem:[%s1053_s30 + $0x40] sm:$0xff]  ;;  %s441_s5 = sshll.u32 %s1113_s19, 4  ;;  %s1172_s17 = scalar_lea.hbm %s1264_s3, %s611_s27  ;;  %s1185_s5 = int_to_ptr.vmem [resolvable:$true] %s441_s5 }
  0x5a   : > { %v264_v9 = vld [vmem:[%s1053_s30 + $0x18] sm:$0xff]  ;;  %300 = vadd.xlane.f32.xlu1 %v299_v3  ;;  %v302_v10 = vadd.f32 %v268_v6, %v267_v5  ;;  %v271_v12 = vld [vmem:[%s1053_s30 + $0x50] sm:$0xff]  ;;  %v270_v15 = vld [vmem:[%s1053_s30 + $0x48] sm:$0xff]  ;;  %s1183_s22 = scalar_lea.hbm %s1263_s2, %s611_s27  ;;  %s428_s6 = scalar_lea.sflag [#allocation9], %s1049_s8 }
  0x5b   : > { %294 = vadd.xlane.f32.xlu0 %v293_v7  ;;  %v296_v11 = vadd.f32 %v264_v9, %v263_v8  ;;  %v272_v13 = vld [vmem:[%s1053_s30 + $0x58] sm:$0xff]  ;;  %v305_v17 = vadd.f32 %v270_v15, %v269_v14  ;;  %v275_v18 = vld [vmem:[%s1053_s30 + $0x70] sm:$0xff]  ;;  %v273_v20 = vld [vmem:[%s1053_s30 + $0x60] sm:$0xff]  ;;  %s767_s28 = scalar_lea.vmem %s1174_s4, 2048  ;;  %p1274_p1 = scmp.ne.s32.totalorder %s1269_s24, 0 }
  0x5c   : > { %v308_v16 = vadd.f32 %v272_v13, %v271_v12  ;;  %v276_v19 = vld [vmem:[%s1053_s30 + $0x78] sm:$0xff]  ;;  %v274_v21 = vld [vmem:[%s1053_s30 + $0x68] sm:$0xff]  ;;  %v279_v24 = vld [vmem:[%s1053_s30 + $0x90] sm:$0xff]  ;;  %p768_p13 = scmp.ne.s32.totalorder %s1174_s4, %s767_s28  ;;  %s877_s29 = smov [#allocation8]  }
  0x5d   : > { %v314_v22 = vadd.f32 %v276_v19, %v275_v18  ;;  %v311_v23 = vadd.f32 %v274_v21, %v273_v20  ;;  %v280_v25 = vld [vmem:[%s1053_s30 + $0x98] sm:$0xff]  ;;  %v277_v26 = vld [vmem:[%s1053_s30 + $0x80] sm:$0xff]  ;;  %v278_v27 = vld [vmem:[%s1053_s30 + $0x88] sm:$0xff] }
  0x5e   : > { %303 = vadd.xlane.f32.xlu1 %v302_v10  ;;  %v320_v28 = vadd.f32 %v280_v25, %v279_v24  ;;  %v317_v29 = vadd.f32 %v278_v27, %v277_v26  ;;  %v283_v30 = vld [vmem:[%s1053_s30 + $0xb0] sm:$0xff]  ;;  %v284_v31 = vld [vmem:[%s1053_s30 + $0xb8] sm:$0xff]  ;;  %v281_v32 = vld [vmem:[%s1053_s30 + $0xa0] sm:$0xff]  ;;  %p769_p11 = pnand %p768_p13, %p1274_p1 }
  0x5f   : > { %297 = vadd.xlane.f32.xlu0 %v296_v11  ;;  %v282_v33 = vld [vmem:[%s1053_s30 + $0xa8] sm:$0xff]  ;;  %v326_v34 = vadd.f32 %v284_v31, %v283_v30  ;;  %v287_v36 = vld [vmem:[%s1053_s30 + $0xd0] sm:$0xff]  ;;  %v288_v37 = vld [vmem:[%s1053_s30 + $0xd8] sm:$0xff] }
  0x60   : > { %v323_v35 = vadd.f32 %v282_v33, %v281_v32  ;;  %v285_v38 = vld [vmem:[%s1053_s30 + $0xc0] sm:$0xff]  ;;  %v286_v39 = vld [vmem:[%s1053_s30 + $0xc8] sm:$0xff]  ;;  %v332_v40 = vadd.f32 %v288_v37, %v287_v36  ;;  %v291_v42 = vld [vmem:[%s1053_s30 + $0xf0] sm:$0xff]  ;;  %p770_p10 = pneg %p769_p11 }
  0x61   : > { %v329_v41 = vadd.f32 %v286_v39, %v285_v38  ;;  %v292_v43 = vld [vmem:[%s1053_s30 + $0xf8] sm:$0xff]  ;;  %v289_v44 = vld [vmem:[%s1053_s30 + $0xe0] sm:$0xff]  ;;  %v290_v45 = vld [vmem:[%s1053_s30 + $0xe8] sm:$0xff]  ;;  %s771_s30 = sshll.u32 %s877_s29, 4  ;;  %s772_s30 = int_to_ptr.vmem [resolvable:$false] %s771_s30 }
  0x62   : > { %309 = vadd.xlane.f32.xlu1 %v308_v16  ;;  %v338_v46 = vadd.f32 %v292_v43, %v291_v42  ;;  %v335_v47 = vadd.f32 %v290_v45, %v289_v44  ;;  %v247_v60 = vld [vmem:[%s1064_s10 + $0x10] sm:$0xff]  ;;  %v245_v61 = vld [vmem:[%s1064_s10] sm:$0xff]  ;;  %v248_v6 = vld [vmem:[%s1064_s10 + $0x18] sm:$0xff]  ;;  %s773_s26 = scalar_lea.vmem %s772_s30, 4096  ;;  %p774_p5 = scmp.lt.s32.totalorder %s1174_s4, %s772_s30 }
  0x63   : > { %306 = vadd.xlane.f32.xlu0 %v305_v17  ;;  %v246_v7 = vld [vmem:[%s1064_s10 + $0x8] sm:$0xff]  ;;  %v249_v17 = vld [vmem:[%s1064_s10 + $0x20] sm:$0xff]  ;;  %v252_v26 = vld [vmem:[%s1064_s10 + $0x38] sm:$0xff]  ;;  %p775_p7 = scmp.lt.s32.totalorder %s773_s26, %s767_s28 }
  0x64   : > { %v250_v16 = vld [vmem:[%s1064_s10 + $0x28] sm:$0xff]  ;;  %v251_v27 = vld [vmem:[%s1064_s10 + $0x30] sm:$0xff]  ;;  %v253_v37 = vld [vmem:[%s1064_s10 + $0x40] sm:$0xff] }
  0x65   : > { %v254_v36 = vld [vmem:[%s1064_s10 + $0x48] sm:$0xff]  ;;  %p776_p9 = por %p775_p7, %p774_p5 }
  0x66   : > { %315 = vadd.xlane.f32.xlu1 %v314_v22 }
  0x67   : > { %312 = vadd.xlane.f32.xlu0 %v311_v23  ;;  %p777_p3 = pnand %p776_p9, %p770_p10 }
  0x6a   : > { %321 = vadd.xlane.f32.xlu1 %v320_v28 }
  0x6b   : > { %318 = vadd.xlane.f32.xlu0 %v317_v29 }
  0x6e   : > { %327 = vadd.xlane.f32.xlu1 %v326_v34 }
  0x6f   : > { %324 = vadd.xlane.f32.xlu0 %v323_v35 }
  0x72   : > { %333 = vadd.xlane.f32.xlu1 %v332_v40 }
  0x73   : > { %330 = vadd.xlane.f32.xlu0 %v329_v41 }
  0x76   : > { %339 = vadd.xlane.f32.xlu1 %v338_v46  ;;  %v256_v46 = vld [vmem:[%s1064_s10 + $0x58] sm:$0xff] }
  0x77   : > { %336 = vadd.xlane.f32.xlu0 %v335_v47  ;;  %v255_v47 = vld [vmem:[%s1064_s10 + $0x50] sm:$0xff] }
  0xe7   : > { %v301_v48 = vpop.xlane.xlu1 %300 }
  0xe8   : > { %v343_v49 = vmax.f32 %v301_v48, 1.0  ;;  %v295_v50 = vpop.xlane.xlu0 %294 }
  0xe9   : > { %v341_v51 = vmax.f32 %v295_v50, 1.0 }
  0xea   : > { %675 = vrsqrt.f32 %v343_v49 }
  0xeb   : > { %677 = vrsqrt.f32 %v341_v51  ;;  %v304_v52 = vpop.xlane.xlu1 %303 }
  0xec   : > { %v344_v53 = vmax.f32 %v304_v52, 1.0  ;;  %v298_v54 = vpop.xlane.xlu0 %297  ;;  %v258_v52 = vld [vmem:[%s1064_s10 + $0x68] sm:$0xff] }
  0xed   : > { %v342_v55 = vmax.f32 %v298_v54, 1.0 }
  0xee   : > { %679 = vrsqrt.f32 %v344_v53  ;;  %v257_v53 = vld [vmem:[%s1064_s10 + $0x60] sm:$0xff] }
  0xef   : > { %681 = vrsqrt.f32 %v342_v55  ;;  %v310_v56 = vpop.xlane.xlu1 %309 }
  0xf0   : > { %v346_v57 = vmax.f32 %v310_v56, 1.0  ;;  %v307_v58 = vpop.xlane.xlu0 %306 }
  0xf1   : > { %v345_v59 = vmax.f32 %v307_v58, 1.0  ;;  %v260_v58 = vld [vmem:[%s1064_s10 + $0x78] sm:$0xff] }
  0xf2   : > { %683 = vrsqrt.f32 %v346_v57 }
  0xf3   : > { %685 = vrsqrt.f32 %v345_v59  ;;  %v316_v62 = vpop.xlane.xlu1 %315  ;;  %v259_v59 = vld [vmem:[%s1064_s10 + $0x70] sm:$0xff] }
  0xf4   : > { %v676_v63 = vpop.eup %675  ;;  %v348_v0 = vmax.f32 %v316_v62, 1.0  ;;  %v313_v1 = vpop.xlane.xlu0 %312 }
  0xf5   : > { %v678_v2 = vpop.eup %677  ;;  %376 = vst.msk [vmem:[%s1105_s23 + $0x10] sm:$0xff] %vm373_vm0, %v676_v63  ;;  %v392_v3 = vmul.f32 %v676_v63, %v247_v60  ;;  %v347_v4 = vmax.f32 %v313_v1, 1.0 }
  0xf6   : > { %374 = vst.msk [vmem:[%s1105_s23] sm:$0xff] %vm373_vm0, %v678_v2  ;;  %v390_v5 = vmul.f32 %v678_v2, %v245_v61  ;;  %687 = vrsqrt.f32 %v348_v0 }
  0xf7   : > { %408 = vst [vmem:[%s1113_s19 + $0x10] sm:$0xff] %v392_v3  ;;  %689 = vrsqrt.f32 %v347_v4  ;;  %v322_v8 = vpop.xlane.xlu1 %321 }
  0xf8   : > { %v680_v9 = vpop.eup %679  ;;  %406 = vst [vmem:[%s1113_s19] sm:$0xff] %v390_v5  ;;  %v350_v10 = vmax.f32 %v322_v8, 1.0  ;;  %v319_v11 = vpop.xlane.xlu0 %318 }
  0xf9   : > { %v682_v12 = vpop.eup %681  ;;  %377 = vst.msk [vmem:[%s1105_s23 + $0x18] sm:$0xff] %vm373_vm0, %v680_v9  ;;  %v393_v13 = vmul.f32 %v680_v9, %v248_v6  ;;  %v349_v14 = vmax.f32 %v319_v11, 1.0 }
  0xfa   : > { %375 = vst.msk [vmem:[%s1105_s23 + $0x8] sm:$0xff] %vm373_vm0, %v682_v12  ;;  %v391_v15 = vmul.f32 %v682_v12, %v246_v7  ;;  %691 = vrsqrt.f32 %v350_v10 }
  0xfb   : > { %409 = vst [vmem:[%s1113_s19 + $0x18] sm:$0xff] %v393_v13  ;;  %693 = vrsqrt.f32 %v349_v14  ;;  %v328_v18 = vpop.xlane.xlu1 %327 }
  0xfc   : > { %v684_v19 = vpop.eup %683  ;;  %407 = vst [vmem:[%s1113_s19 + $0x8] sm:$0xff] %v391_v15  ;;  %v352_v20 = vmax.f32 %v328_v18, 1.0  ;;  %v325_v21 = vpop.xlane.xlu0 %324 }
  0xfd   : > { %v686_v22 = vpop.eup %685  ;;  %379 = vst.msk [vmem:[%s1105_s23 + $0x28] sm:$0xff] %vm373_vm0, %v684_v19  ;;  %v395_v23 = vmul.f32 %v684_v19, %v250_v16  ;;  %v351_v24 = vmax.f32 %v325_v21, 1.0 }
  0xfe   : > { %378 = vst.msk [vmem:[%s1105_s23 + $0x20] sm:$0xff] %vm373_vm0, %v686_v22  ;;  %v394_v25 = vmul.f32 %v686_v22, %v249_v17  ;;  %695 = vrsqrt.f32 %v352_v20 }
  0xff   : > { %411 = vst [vmem:[%s1113_s19 + $0x28] sm:$0xff] %v395_v23  ;;  %697 = vrsqrt.f32 %v351_v24  ;;  %v334_v28 = vpop.xlane.xlu1 %333 }
 0x100   : > { %v688_v29 = vpop.eup %687  ;;  %410 = vst [vmem:[%s1113_s19 + $0x20] sm:$0xff] %v394_v25  ;;  %v354_v30 = vmax.f32 %v334_v28, 1.0  ;;  %v331_v31 = vpop.xlane.xlu0 %330 }
 0x101   : > { %v690_v32 = vpop.eup %689  ;;  %381 = vst.msk [vmem:[%s1105_s23 + $0x38] sm:$0xff] %vm373_vm0, %v688_v29  ;;  %v397_v33 = vmul.f32 %v688_v29, %v252_v26  ;;  %v353_v34 = vmax.f32 %v331_v31, 1.0 }
 0x102   : > { %380 = vst.msk [vmem:[%s1105_s23 + $0x30] sm:$0xff] %vm373_vm0, %v690_v32  ;;  %v396_v35 = vmul.f32 %v690_v32, %v251_v27  ;;  %699 = vrsqrt.f32 %v354_v30 }
 0x103   : > { %413 = vst [vmem:[%s1113_s19 + $0x38] sm:$0xff] %v397_v33  ;;  %701 = vrsqrt.f32 %v353_v34  ;;  %v340_v38 = vpop.xlane.xlu1 %339 }
 0x104   : > { %v692_v39 = vpop.eup %691  ;;  %412 = vst [vmem:[%s1113_s19 + $0x30] sm:$0xff] %v396_v35  ;;  %v356_v40 = vmax.f32 %v340_v38, 1.0  ;;  %v337_v41 = vpop.xlane.xlu0 %336 }
 0x105   : > { %v694_v42 = vpop.eup %693  ;;  %383 = vst.msk [vmem:[%s1105_s23 + $0x48] sm:$0xff] %vm373_vm0, %v692_v39  ;;  %v399_v43 = vmul.f32 %v692_v39, %v254_v36  ;;  %v355_v44 = vmax.f32 %v337_v41, 1.0 }
 0x106   : > { %382 = vst.msk [vmem:[%s1105_s23 + $0x40] sm:$0xff] %vm373_vm0, %v694_v42  ;;  %v398_v45 = vmul.f32 %v694_v42, %v253_v37  ;;  %703 = vrsqrt.f32 %v356_v40 }
 0x107   : > { %415 = vst [vmem:[%s1113_s19 + $0x48] sm:$0xff] %v399_v43  ;;  %705 = vrsqrt.f32 %v355_v44 }
 0x108   : > { %v696_v48 = vpop.eup %695  ;;  %414 = vst [vmem:[%s1113_s19 + $0x40] sm:$0xff] %v398_v45 }
 0x109   : > { %v698_v49 = vpop.eup %697  ;;  %385 = vst.msk [vmem:[%s1105_s23 + $0x58] sm:$0xff] %vm373_vm0, %v696_v48  ;;  %v401_v50 = vmul.f32 %v696_v48, %v256_v46 }
 0x10a   : > { %384 = vst.msk [vmem:[%s1105_s23 + $0x50] sm:$0xff] %vm373_vm0, %v698_v49  ;;  %v400_v51 = vmul.f32 %v698_v49, %v255_v47 }
 0x10b   : > { %417 = vst [vmem:[%s1113_s19 + $0x58] sm:$0xff] %v401_v50 }
 0x10c   : > { %v700_v54 = vpop.eup %699  ;;  %416 = vst [vmem:[%s1113_s19 + $0x50] sm:$0xff] %v400_v51 }
 0x10d   : > { %v702_v55 = vpop.eup %701  ;;  %387 = vst.msk [vmem:[%s1105_s23 + $0x68] sm:$0xff] %vm373_vm0, %v700_v54  ;;  %v403_v56 = vmul.f32 %v700_v54, %v258_v52 }
 0x10e   : > { %386 = vst.msk [vmem:[%s1105_s23 + $0x60] sm:$0xff] %vm373_vm0, %v702_v55  ;;  %v402_v57 = vmul.f32 %v702_v55, %v257_v53 }
 0x10f   : > { %419 = vst [vmem:[%s1113_s19 + $0x68] sm:$0xff] %v403_v56 }
 0x110   : > { %v704_v60 = vpop.eup %703  ;;  %418 = vst [vmem:[%s1113_s19 + $0x60] sm:$0xff] %v402_v57 }
 0x111   : > { %v706_v61 = vpop.eup %705  ;;  %389 = vst.msk [vmem:[%s1105_s23 + $0x78] sm:$0xff] %vm373_vm0, %v704_v60  ;;  %v405_v62 = vmul.f32 %v704_v60, %v260_v58 }
 0x112   : > { %388 = vst.msk [vmem:[%s1105_s23 + $0x70] sm:$0xff] %vm373_vm0, %v706_v61  ;;  %v404_v63 = vmul.f32 %v706_v61, %v259_v59 }
 0x113   : > { %421 = vst [vmem:[%s1113_s19 + $0x78] sm:$0xff] %v405_v62 }
 0x114   : > { %780 = shalt.err (!%p777_p3)
}
 0x115   : > { %s781_s7 = scalar_lea.hbm %s1172_s17, 2048  ;;  %s785_s27 = scalar_lea.hbm %s1264_s3, 4096 }
 0x116   : > { %p782_p12 = scmp.ne.s32.totalorder %s1172_s17, %s781_s7  ;;  %p786_p2 = scmp.lt.u32.totalorder %s1172_s17, %s1264_s3 }
 0x117   : > { %p787_p4 = scmp.lt.u32.totalorder %s785_s27, %s781_s7  ;;  %p789_p13 = scmp.lt.u32.totalorder %s781_s7, %s1172_s17 }
 0x118   : > { %p783_p8 = pnand %p782_p12, %p1274_p1 }
 0x119   : > { %p788_p6 = por %p787_p4, %p786_p2 }
 0x11a   : > { %p784_p0 = pneg %p783_p8 }
 0x11b   : > { %p790_p11 = por %p789_p13, %p788_p6 }
 0x11d   : > { %p791_p10 = pnand %p790_p11, %p784_p0 }
 0x11f   : > { %794 = shalt.err (!%p791_p10)
}
 0x120   : > { %s878_s16 = smov 128   ;;  %s879_s20 = smov 8   ;;  %420 = vst [vmem:[%s1113_s19 + $0x70] sm:$0xff] %v404_v63 }
 0x121   : > { %618 = dma.vmem_to_hbm [thread:$0]  (%p1274_p1), %s1174_s4, 2048, %s1172_s17, %s428_s6, %s878_s16, %s878_s16, %s879_s20  }
 0x122   : > { %s423_s28 = scalar_lea.sflag [#allocation4], %s1049_s8  ;;  %s795_s29 = scalar_lea.vmem %s1185_s5, 2048 }
 0x123   : > { %p796_p5 = scmp.ne.s32.totalorder %s1185_s5, %s795_s29  ;;  %s880_s30 = smov [#allocation7]  }
 0x124   : > { %s799_s26 = sshll.u32 %s880_s30, 4  ;;  %s800_s26 = int_to_ptr.vmem [resolvable:$false] %s799_s26 }
 0x125   : > { %p797_p7 = pnand %p796_p5, %p1274_p1  ;;  %s801_s7 = scalar_lea.vmem %s800_s26, 4096 }
 0x126   : > { %p802_p3 = scmp.lt.s32.totalorder %s1185_s5, %s800_s26  ;;  %p803_p12 = scmp.lt.s32.totalorder %s801_s7, %s795_s29 }
 0x127   : > { %p798_p9 = pneg %p797_p7 }
 0x128   : > { %p804_p8 = por %p803_p12, %p802_p3 }
 0x12a   : > { %p805_p0 = pnand %p804_p8, %p798_p9 }
 0x12c   : > { %808 = shalt.err (!%p805_p0)
}
 0x12d   : > { %s809_s19 = scalar_lea.hbm %s1183_s22, 2048  ;;  %s813_s6 = scalar_lea.hbm %s1263_s2, 4096 }
 0x12e   : > { %p810_p2 = scmp.ne.s32.totalorder %s1183_s22, %s809_s19  ;;  %p814_p13 = scmp.lt.u32.totalorder %s1183_s22, %s1263_s2 }
 0x12f   : > { %p815_p11 = scmp.lt.u32.totalorder %s813_s6, %s809_s19  ;;  %p817_p5 = scmp.lt.u32.totalorder %s809_s19, %s1183_s22 }
 0x130   : > { %p811_p4 = pnand %p810_p2, %p1274_p1 }
 0x131   : > { %p816_p10 = por %p815_p11, %p814_p13 }
 0x132   : > { %p812_p6 = pneg %p811_p4 }
 0x133   : > { %p818_p7 = por %p817_p5, %p816_p10 }
 0x135   : > { %p819_p9 = pnand %p818_p7, %p812_p6 }
 0x137   : > { %822 = shalt.err (!%p819_p9)
}
 0x138   : > { %617 = dma.vmem_to_hbm [thread:$0]  (%p1274_p1), %s1185_s5, 2048, %s1183_s22, %s423_s28, %s878_s16, %s878_s16, %s879_s20  }
 0x139 PF: > { %s472_s27 = sand.u32 1, %s857_s12   ;;  %p1275_p3 = scmp.ne.s32.totalorder %s1270_s25, 0 }
 0x13a   : > { %p1276_p12 = scmp.ge.s32.totalorder %s869_s15, 2  ;;  %s473_s9 = scalar_lea.sflag [#allocation4], %s472_s27 }
 0x13c   : > { %p629_p8 = pnand %p1276_p12, %p1275_p3 }
 0x13e   : > { %848 = dma.done.wait (!%p629_p8), %s473_s9, 2048  }
 0x13f   : > { %850 = vsyncadd (!%p629_p8), %s473_s9, 4294965248  ;;  %s482_s24 = scalar_lea.sflag [#allocation9], %s472_s27 }
 0x140   : > { %852 = dma.done.wait (!%p629_p8), %s482_s24, 2048  }
 0x141   : > { %854 = vsyncadd (!%p629_p8), %s482_s24, 4294965248  ;;  %p23_p1 = scmp.ge.s32.totalorder %s926_s18, 4   ;;  %s1277_s12 = smov %s861_s13 }
 0x142   : > { %s1278_s13 = smov %s865_s14  ;;  %s1279_s14 = smov %s938_s21 }
 0x143   : > { %s1280_s15 = smov %s926_s18  ;;  %25 = sbr.rel (!%p23_p1) target bundleno = 9 (0x9), region = 103 }
 0x14a   :  { %487 = vsyncpa [#allocation3], 1 }
 0x14b   :  { %489 = vsyncpa [#allocation3 + $0x1], 1 }
 0x14c   :  { %490 = vsyncpa [#allocation6], 1 }
 0x14d   :  { %492 = vsyncpa [#allocation6 + $0x1], 1 }
 0x14e   :  { %493 = vsyncpa [#allocation4], 1 }
 0x14f   :  { %495 = vsyncpa [#allocation4 + $0x1], 1 }
 0x150   :  { %496 = vsyncpa [#allocation9], 1 }
 0x151   :  { %498 = vsyncpa [#allocation9 + $0x1], 1 }

</bundles_post_ra>
